<compile_context>
chip_gen: v7x
topology: tpu7x:2x2x1
jax: 0.10.0
libtpu: 0.0.40
codegen_flags: <defaults>
</compile_context>

<pallas_src>
import jax
import jax.numpy as jnp
from jax.experimental import pallas as pl
from jax.experimental.pallas import tpu as pltpu


def _identity_kernel(x_ref, o_ref):
    # Pure pass-through: the entire forward of the abstract BaseModel.
    o_ref[...] = x_ref[...]


_LANE_CANDIDATES = (2048, 1024, 512, 256, 128)  # all multiples of 128 -> lane-dense
_TILE_BYTES = 4 * 1024 * 1024                   # 4 MiB block; 2 in + 2 out bufs
                                                # ~16 MiB, fits 32 MiB scoped VMEM
                                                # on every generation incl. v7x.


def base_model_forward(x: jax.Array) -> jax.Array:
    """Forward of BaseModel: identity (abstract forward defines no compute)."""
    total = x.size
    if total == 0:
        return x

    # Largest lane width from the candidate set that divides the flat size.
    # If none divides, skip the kernel entirely: the semantics are identity,
    # and jnp.pad + slice would each add a full-array HBM round trip.
    lanes = next((c for c in _LANE_CANDIDATES if total % c == 0), None)
    if lanes is None:
        return x  # fast path: pure identity, zero HBM traffic

    rows = total // lanes
    itemsize = x.dtype.itemsize

    if rows <= 8:
        # Block equals the full array -> (8,128) rule satisfied trivially.
        tr = rows
    else:
        tr_target = max(8, (_TILE_BYTES // (lanes * itemsize)) // 8 * 8)
        half = (rows // 2) // 8 * 8  # aim for >= 2 grid steps (v7x: 2 TCs)
        tr = min(tr_target, half) if half >= 8 else 8
    grid = pl.cdiv(rows, tr)  # partial trailing block is masked by Pallas

    x2 = x.reshape(rows, lanes)  # contiguous view of a contiguous array

    out2 = pl.pallas_call(
        _identity_kernel,
        out_shape=jax.ShapeDtypeStruct((rows, lanes), x2.dtype),
        grid_spec=pltpu.PrefetchScalarGridSpec(
            num_scalar_prefetch=0,
            grid=(grid,),
            in_specs=[pl.BlockSpec((tr, lanes), lambda i: (i, 0))],
            out_specs=pl.BlockSpec((tr, lanes), lambda i: (i, 0)),
        ),
        # Identity: output may reuse the input buffer.  XLA inserts a copy
        # only if it cannot alias safely; values are unchanged either way.
        input_output_aliases={0: 0},
        compiler_params=pltpu.CompilerParams(
            dimension_semantics=("parallel",),  # shard row tiles across TCs
            vmem_limit_bytes=32 * 1024 * 1024,
        ),
        cost_estimate=pl.CostEstimate(
            flops=0,
            transcendentals=0,
            bytes_accessed=2 * total * itemsize,  # exact: no padded traffic
        ),
    )(x2)

    return out2.reshape(x.shape)


class BaseModelPallas:
    """JAX/Pallas mirror of the PyTorch BaseModel ABC."""

    def __init__(self, config):
        self.config = config  # no parameters: __init__ only stores config

    def forward(self, x):
        # Abstract in PyTorch; identity pass-through here (see TODOs above).
        return base_model_forward(x)

    def __call__(self, x):
        return self.forward(x)


if __name__ == "__main__":
    key = jax.random.PRNGKey(0)
    k0, k1, k2, k3 = jax.random.split(key, 4)

    model = BaseModelPallas(config={})

    # Small NCHW input consistent with a UNet-style model:
    # 2048 elements -> lanes=2048, rows=1, single full-array block.
    x = jax.random.normal(k0, (2, 4, 16, 16), dtype=jnp.float32)
    y = jax.block_until_ready(model(x))
    assert y.shape == x.shape and y.dtype == x.dtype
    assert bool(jnp.array_equal(y, x)), "identity forward mismatch"

    # Multi-step grid: 32768 elems -> lanes=2048, rows=16, tr=8, grid=2
    # (both v7x TensorCores get a tile).
    x2 = jax.random.normal(k1, (2, 8, 32, 64), dtype=jnp.float32)
    y2 = jax.block_until_ready(model(x2))
    assert y2.shape == x2.shape and y2.dtype == x2.dtype
    assert bool(jnp.array_equal(y2, x2)), "identity forward mismatch (multi-tile)"

    # Partial trailing block: 2688 elems -> lanes=128, rows=21, tr=8, grid=3.
    x3 = jax.random.normal(k2, (3, 7, 8, 16), dtype=jnp.float32)
    y3 = jax.block_until_ready(model(x3))
    assert y3.shape == x3.shape and y3.dtype == x3.dtype
    assert bool(jnp.array_equal(y3, x3)), "identity forward mismatch (partial block)"

    # Odd size with no 128-multiple divisor -> kernel bypass fast path.
    x4 = jax.random.normal(k3, (3, 5, 7, 11), dtype=jnp.float32)
    y4 = jax.block_until_ready(model(x4))
    assert y4.shape == x4.shape and y4.dtype == x4.dtype
    assert bool(jnp.array_equal(y4, x4)), "identity forward mismatch (bypass path)"

    print("KERNEL_OK")
</pallas_src>

<mosaic_0001>
module attributes {stable_mosaic.version = 11 : i64} {
  func.func @_identity_kernel(%arg0: i32, %arg1: memref<1x2048xf32, #tpu.memory_space<vmem>>, %arg2: memref<1x2048xf32, #tpu.memory_space<vmem>>) attributes {dimension_semantics = [#tpu.dimension_semantics<parallel>], iteration_bounds = array<i64: 1>, scalar_prefetch = 0 : i64, scratch_operands = 0 : i64, tpu.core_type = #tpu.core_type<tc>, window_params = [{transform_indices = @transform_0, window_bounds = array<i64: 1, 2048>}, {transform_indices = @transform_1, window_bounds = array<i64: 1, 2048>}]} {
    %c0 = arith.constant 0 : index
    %c0_0 = arith.constant 0 : index
    %0 = vector.load %arg1[%c0, %c0_0] : memref<1x2048xf32, #tpu.memory_space<vmem>>, vector<1x2048xf32>
    %c0_1 = arith.constant 0 : index
    %c0_2 = arith.constant 0 : index
    %1 = vector.load %arg2[%c0_1, %c0_2] : memref<1x2048xf32, #tpu.memory_space<vmem>>, vector<1x2048xf32>
    tpu.vector_store %arg2[%c0_1, %c0_2], %0 {strides = array<i32>} : memref<1x2048xf32, #tpu.memory_space<vmem>>, vector<1x2048xf32>,
    return
  }
  func.func @transform_0(%arg0: i32) -> (i32, i32) {
    %c0_i32 = arith.constant 0 : i32
    %c0_i32_0 = arith.constant 0 : i32
    return %arg0, %c0_i32 : i32, i32
  }
  func.func @transform_1(%arg0: i32) -> (i32, i32) {
    %c0_i32 = arith.constant 0 : i32
    %c0_i32_0 = arith.constant 0 : i32
    return %arg0, %c0_i32 : i32, i32
  }
}

</mosaic_0001>

<bundles_post_ra>
// kernel: tpu_custom_call.1
= control target key start
LH: loop header
LB: loop body
LE: loop exit
PB: predicated region body
PF: predicated region fallthrough
CT: control target
= control target key end

     0   :  { %6 = vsyncpa [#allocation3], 0  ;;  %s126_s0 = inlined_call_operand.hbm [shape: f32[1,2048], index: 0, kind: input, shape index: {}, may-alias: {0,1}]   ;;  %s127_s1 = inlined_call_operand.hbm [shape: f32[1,2048], index: 1, kind: output, shape index: {}, may-alias: {0,1}]  }
   0x1   :  { %7 = vsyncpa [#allocation4], 0  ;;  %s90_s6 = smov [#allocation2]   ;;  %s42_s10 = scalar_lea.hbm %s126_s0, 256 }
   0x2   :  { %s14_s7 = sshll.u32 %s90_s6, 4  ;;  %p43_p0 = scmp.ne.s32.totalorder %s126_s0, %s42_s10  ;;  %s15_s7 = int_to_ptr.vmem [resolvable:$true] %s14_s7 }
   0x3   :  { %p46_p1 = scmp.lt.u32.totalorder %s42_s10, %s126_s0 }
   0x5   :  { %p48_p2 = pnand %p46_p1, %p43_p0 }
   0x7   :  { %51 = shalt.err (!%p48_p2)
}
   0x8   :  { %s52_s15 = scalar_lea.vmem %s15_s7, 256  ;;  %p57_p4 = scmp.lt.s32.totalorder %s15_s7, %s15_s7 }
   0x9   :  { %p53_p3 = scmp.ne.s32.totalorder %s15_s7, %s52_s15  ;;  %p58_p5 = scmp.lt.s32.totalorder %s52_s15, %s52_s15 }
   0xb   :  { %p59_p6 = por %p58_p5, %p57_p4 }
   0xd   :  { %p60_p7 = pnand %p59_p6, %p53_p3 }
   0xf   :  { %63 = shalt.err (!%p60_p7)
}
  0x10   :  { %17 = dma.hbm_to_vmem [thread:$0]  %s126_s0, 256, %s15_s7, [#allocation3]  }
  0x11   :  { %86 = dma.done.wait [#allocation3], 256  }
  0x12   :  { %87 = vsyncadd [#allocation3], 4294967040  ;;  %s91_s18 = smov [#allocation5]   ;;  %v21_v0 = vld [vmem:[#allocation2] sm:$0xff]  ;;  %v22_v1 = vld [vmem:[#allocation2 + $0x8] sm:$0xff] }
  0x13   :  { %s31_s19 = sshll.u32 %s91_s18, 4  ;;  %23 = vst [vmem:[#allocation5] sm:$0xff] %v21_v0  ;;  %24 = vst [vmem:[#allocation5 + $0x8] sm:$0xff] %v22_v1  ;;  %s32_s19 = int_to_ptr.vmem [resolvable:$true] %s31_s19 }
  0x14   :  { %s64_s20 = scalar_lea.vmem %s32_s19, 256  ;;  %p69_p9 = scmp.lt.s32.totalorder %s32_s19, %s32_s19 }
  0x15   :  { %p65_p8 = scmp.ne.s32.totalorder %s32_s19, %s64_s20  ;;  %p70_p10 = scmp.lt.s32.totalorder %s64_s20, %s64_s20 }
  0x17   :  { %p71_p11 = por %p70_p10, %p69_p9 }
  0x19   :  { %p72_p12 = pnand %p71_p11, %p65_p8 }
  0x1b   :  { %75 = shalt.err (!%p72_p12)
}
  0x1c   :  { %s76_s0 = scalar_lea.hbm %s127_s1, 256 }
  0x1d   :  { %p77_p13 = scmp.ne.s32.totalorder %s127_s1, %s76_s0  ;;  %p80_p0 = scmp.lt.u32.totalorder %s76_s0, %s127_s1 }
  0x1f   :  { %p82_p1 = pnand %p80_p0, %p77_p13 }
  0x21   :  { %85 = shalt.err (!%p82_p1)
}
  0x22   :  { %34 = dma.vmem_to_hbm [thread:$0]  %s32_s19, 256, %s127_s1, [#allocation4]  }
  0x23   :  { %88 = dma.done.wait [#allocation4], 256  }
  0x24   :  { %89 = vsyncadd [#allocation4], 4294967040 }
  0x25   :  { %38 = vsyncpa [#allocation3], 1 }
  0x26   :  { %39 = vsyncpa [#allocation4], 1 }

</bundles_post_ra>
